<compile_context>
chip_gen: v7x
topology: tpu7x:2x2x1
jax: 0.10.0
libtpu: 0.0.40
codegen_flags: <defaults>
</compile_context>

<pallas_src>
import jax
import jax.numpy as jnp
from jax.experimental import pallas as pl
from jax.experimental.pallas import tpu as pltpu


def _round_up(x: int, m: int) -> int:
    return ((x + m - 1) // m) * m


def _make_kernel(norm: bool):
    def mlp_kernel(x_ref, w0_ref, b0_ref, w1_ref, b1_ref,
                   w2_ref, b2_ref, w3_ref, b3_ref, out_ref):
        # Cast the streamed tile to bf16 in-kernel (no-op if x already bf16):
        # avoids a separate XLA cast/pad pass over the whole array in HBM.
        x = x_ref[...].astype(jnp.bfloat16)
        # fc0 + relu (bf16 x bf16 -> f32 accumulate, f32 bias)
        h = jnp.dot(x, w0_ref[...],
                    preferred_element_type=jnp.float32) + b0_ref[...]
        h = jnp.maximum(h, 0.0)
        # fc1 + relu
        h = jnp.dot(h.astype(jnp.bfloat16), w1_ref[...],
                    preferred_element_type=jnp.float32) + b1_ref[...]
        h = jnp.maximum(h, 0.0)
        # fc2 + relu
        h = jnp.dot(h.astype(jnp.bfloat16), w2_ref[...],
                    preferred_element_type=jnp.float32) + b2_ref[...]
        h = jnp.maximum(h, 0.0)
        # fc3 + relu
        h = jnp.dot(h.astype(jnp.bfloat16), w3_ref[...],
                    preferred_element_type=jnp.float32) + b3_ref[...]
        h = jnp.maximum(h, 0.0)
        if norm:
            # F.normalize(h, p=2, dim=1): h / max(||h||_2, 1e-12)
            # rsqrt runs on the EUP (otherwise-idle slot); clamping the
            # squared norm at 1e-24 == clamping the norm at 1e-12 in f32.
            sq = jnp.sum(h * h, axis=-1, keepdims=True)
            inv = jax.lax.rsqrt(jnp.maximum(sq, 1e-24))
            h = h * inv
        out_ref[...] = h.astype(out_ref.dtype)
    return mlp_kernel


def _choose_tile_b(B: int, tile_cap: int) -> int:
    """Tile size: full-batch block for tiny B, else a multiple of 16 that
    yields >=2 grid steps (v7x megacore) and <16 dead rows per tile."""
    if B < 32:
        return B                       # full-dim block: always legal
    n = max(pl.cdiv(B, tile_cap), 2)   # >=2 grid steps
    tile_b = _round_up(pl.cdiv(B, n), 16)
    return min(tile_b, B)


def classifier_mlp_forward(x_nchw, params, norm: bool = False,
                           tile_cap: int = 2048):
    """x_nchw: (B, C, H, W) with C*H*W == 784. Returns (B, 16) float32."""
    B = x_nchw.shape[0]
    x = x_nchw.reshape(B, -1)          # same as torch .view(B, -1); no copy
    assert x.shape[1] == 784, "ClassifierMLP expects 784 flattened features"
    if x.dtype not in (jnp.float32, jnp.bfloat16):
        x = x.astype(jnp.float32)

    w0, b0, w1, b1, w2, b2, w3, b3 = params
    # bf16 weights (native MXU path); biases and accumulation stay f32.
    ws = [w.astype(jnp.bfloat16) for w in (w0, w1, w2, w3)]
    bs = [b.astype(jnp.float32).reshape(1, -1) for b in (b0, b1, b2, b3)]

    tile_b = _choose_tile_b(B, tile_cap)
    grid = (pl.cdiv(B, tile_b),)

    def resident_spec(arr):
        # Full-array block, constant index -> DMA'd once, stays in VMEM.
        return pl.BlockSpec(arr.shape, lambda i: (0, 0))

    kernel = _make_kernel(norm)

    out = pl.pallas_call(
        kernel,
        out_shape=jax.ShapeDtypeStruct((B, 16), jnp.float32),
        grid=grid,
        in_specs=[
            pl.BlockSpec((tile_b, 784), lambda i: (i, 0)),   # x tiles stream
            resident_spec(ws[0]), resident_spec(bs[0]),
            resident_spec(ws[1]), resident_spec(bs[1]),
            resident_spec(ws[2]), resident_spec(bs[2]),
            resident_spec(ws[3]), resident_spec(bs[3]),
        ],
        out_specs=pl.BlockSpec((tile_b, 16), lambda i: (i, 0)),
        compiler_params=pltpu.CompilerParams(
            dimension_semantics=("parallel",),   # megacore sharding on v7x
            vmem_limit_bytes=48 * 1024 * 1024,   # safe on v7x's 64 MiB VMEM
        ),
    )(x, ws[0], bs[0], ws[1], bs[1], ws[2], bs[2], ws[3], bs[3])

    return out


def init_params(key):
    """Deterministic init matching nn.Linear shapes.

    PyTorch Linear weight is (out, in); we store the transposed (in, out) so
    the kernel computes x @ W + b (== x @ weight.T + bias). Biases are (1, out).
    """
    dims = [(784, 256), (256, 256), (256, 32), (32, 16)]
    params = []
    for din, dout in dims:
        kw, kb, key = jax.random.split(key, 3)
        bound = 1.0 / (din ** 0.5)
        w = jax.random.uniform(kw, (din, dout), jnp.float32, -bound, bound)
        b = jax.random.uniform(kb, (1, dout), jnp.float32, -bound, bound)
        params += [w, b]
    return tuple(params)


def reference_forward(x_nchw, params, norm: bool = False):
    """Plain-JAX f32 reference for correctness checking."""
    B = x_nchw.shape[0]
    h = x_nchw.reshape(B, -1).astype(jnp.float32)
    w0, b0, w1, b1, w2, b2, w3, b3 = params
    for w, b in [(w0, b0), (w1, b1), (w2, b2), (w3, b3)]:
        h = jnp.maximum(h @ w + b, 0.0)
    if norm:
        h = h / jnp.maximum(jnp.linalg.norm(h, axis=-1, keepdims=True), 1e-12)
    return h


if __name__ == "__main__":
    key = jax.random.PRNGKey(0)
    kx, kx2, kp = jax.random.split(key, 3)
    params = init_params(kp)

    # MNIST-like input: batch=2, NCHW (2, 1, 28, 28) -> flattens to 784.
    # B < 32 path: single full-batch block.
    x_small = jax.random.normal(kx, (2, 1, 28, 28), jnp.float32)
    out = jax.block_until_ready(classifier_mlp_forward(x_small, params,
                                                       norm=False))
    ref = reference_forward(x_small, params, norm=False)
    assert out.shape == (2, 16)
    # bf16 weights / casts with f32 accumulation -> relaxed tolerance vs f32.
    assert jnp.allclose(out, ref, atol=3e-2, rtol=3e-2)

    # Ragged batch: B=37 -> tile_b=32, grid=2 with a partial last block,
    # plus the normalize branch.
    x_ragged = jax.random.normal(kx2, (37, 1, 28, 28), jnp.float32)
    out2 = jax.block_until_ready(classifier_mlp_forward(x_ragged, params,
                                                        norm=True))
    ref2 = reference_forward(x_ragged, params, norm=True)
    assert out2.shape == (37, 16)
    assert jnp.allclose(out2, ref2, atol=3e-2, rtol=3e-2)

    print("KERNEL_OK")
</pallas_src>

<mosaic_0001>
module attributes {stable_mosaic.version = 11 : i64} {
  func.func @mlp_kernel(%arg0: i32, %arg1: memref<2x784xf32, #tpu.memory_space<vmem>>, %arg2: memref<784x256xbf16, #tpu.memory_space<vmem>>, %arg3: memref<1x256xf32, #tpu.memory_space<vmem>>, %arg4: memref<256x256xbf16, #tpu.memory_space<vmem>>, %arg5: memref<1x256xf32, #tpu.memory_space<vmem>>, %arg6: memref<256x32xbf16, #tpu.memory_space<vmem>>, %arg7: memref<1x32xf32, #tpu.memory_space<vmem>>, %arg8: memref<32x16xbf16, #tpu.memory_space<vmem>>, %arg9: memref<1x16xf32, #tpu.memory_space<vmem>>, %arg10: memref<2x16xf32, #tpu.memory_space<vmem>>) attributes {dimension_semantics = [#tpu.dimension_semantics<parallel>], iteration_bounds = array<i64: 1>, scalar_prefetch = 0 : i64, scratch_operands = 0 : i64, tpu.core_type = #tpu.core_type<tc>, window_params = [{transform_indices = @transform_0, window_bounds = array<i64: 2, 784>}, {pipeline_mode = #tpu.pipeline_mode<synchronous>, transform_indices = @transform_1, window_bounds = array<i64: 784, 256>}, {pipeline_mode = #tpu.pipeline_mode<synchronous>, transform_indices = @transform_2, window_bounds = array<i64: 1, 256>}, {pipeline_mode = #tpu.pipeline_mode<synchronous>, transform_indices = @transform_3, window_bounds = array<i64: 256, 256>}, {pipeline_mode = #tpu.pipeline_mode<synchronous>, transform_indices = @transform_4, window_bounds = array<i64: 1, 256>}, {pipeline_mode = #tpu.pipeline_mode<synchronous>, transform_indices = @transform_5, window_bounds = array<i64: 256, 32>}, {pipeline_mode = #tpu.pipeline_mode<synchronous>, transform_indices = @transform_6, window_bounds = array<i64: 1, 32>}, {pipeline_mode = #tpu.pipeline_mode<synchronous>, transform_indices = @transform_7, window_bounds = array<i64: 32, 16>}, {pipeline_mode = #tpu.pipeline_mode<synchronous>, transform_indices = @transform_8, window_bounds = array<i64: 1, 16>}, {transform_indices = @transform_9, window_bounds = array<i64: 2, 16>}]} {
    %c0 = arith.constant 0 : index
    %c0_0 = arith.constant 0 : index
    %0 = vector.load %arg1[%c0, %c0_0] : memref<2x784xf32, #tpu.memory_space<vmem>>, vector<2x784xf32>
    %1 = arith.truncf %0 : vector<2x784xf32> to vector<2x784xbf16>
    %c0_1 = arith.constant 0 : index
    %c0_2 = arith.constant 0 : index
    %2 = vector.load %arg2[%c0_1, %c0_2] : memref<784x256xbf16, #tpu.memory_space<vmem>>, vector<784x256xbf16>
    %cst = arith.constant dense<0.000000e+00> : vector<2x256xf32>
    %3 = tpu.matmul %1, %2, %cst {dimension_numbers = #tpu.dot_dimension_numbers<[1], [0], [0], [1], [0, 0, 1, 1], [], []>} : vector<2x784xbf16>, vector<784x256xbf16>, vector<2x256xf32> -> vector<2x256xf32>
    %c0_3 = arith.constant 0 : index
    %c0_4 = arith.constant 0 : index
    %4 = vector.load %arg3[%c0_3, %c0_4] : memref<1x256xf32, #tpu.memory_space<vmem>>, vector<1x256xf32>
    %5 = vector.broadcast %4 : vector<1x256xf32> to vector<2x256xf32>
    %6 = arith.addf %3, %5 : vector<2x256xf32>
    %cst_5 = arith.constant 0.000000e+00 : f32
    %7 = vector.broadcast %cst_5 : f32 to vector<2x256xf32>
    %8 = arith.maximumf %6, %7 : vector<2x256xf32>
    %9 = arith.truncf %8 : vector<2x256xf32> to vector<2x256xbf16>
    %c0_6 = arith.constant 0 : index
    %c0_7 = arith.constant 0 : index
    %10 = vector.load %arg4[%c0_6, %c0_7] : memref<256x256xbf16, #tpu.memory_space<vmem>>, vector<256x256xbf16>
    %cst_8 = arith.constant dense<0.000000e+00> : vector<2x256xf32>
    %11 = tpu.matmul %9, %10, %cst_8 {dimension_numbers = #tpu.dot_dimension_numbers<[1], [0], [0], [1], [0, 0, 1, 1], [], []>} : vector<2x256xbf16>, vector<256x256xbf16>, vector<2x256xf32> -> vector<2x256xf32>
    %c0_9 = arith.constant 0 : index
    %c0_10 = arith.constant 0 : index
    %12 = vector.load %arg5[%c0_9, %c0_10] : memref<1x256xf32, #tpu.memory_space<vmem>>, vector<1x256xf32>
    %13 = vector.broadcast %12 : vector<1x256xf32> to vector<2x256xf32>
    %14 = arith.addf %11, %13 : vector<2x256xf32>
    %cst_11 = arith.constant 0.000000e+00 : f32
    %15 = vector.broadcast %cst_11 : f32 to vector<2x256xf32>
    %16 = arith.maximumf %14, %15 : vector<2x256xf32>
    %17 = arith.truncf %16 : vector<2x256xf32> to vector<2x256xbf16>
    %c0_12 = arith.constant 0 : index
    %c0_13 = arith.constant 0 : index
    %18 = vector.load %arg6[%c0_12, %c0_13] : memref<256x32xbf16, #tpu.memory_space<vmem>>, vector<256x32xbf16>
    %cst_14 = arith.constant dense<0.000000e+00> : vector<2x32xf32>
    %19 = tpu.matmul %17, %18, %cst_14 {dimension_numbers = #tpu.dot_dimension_numbers<[1], [0], [0], [1], [0, 0, 1, 1], [], []>} : vector<2x256xbf16>, vector<256x32xbf16>, vector<2x32xf32> -> vector<2x32xf32>
    %c0_15 = arith.constant 0 : index
    %c0_16 = arith.constant 0 : index
    %20 = vector.load %arg7[%c0_15, %c0_16] : memref<1x32xf32, #tpu.memory_space<vmem>>, vector<1x32xf32>
    %21 = vector.broadcast %20 : vector<1x32xf32> to vector<2x32xf32>
    %22 = arith.addf %19, %21 : vector<2x32xf32>
    %cst_17 = arith.constant 0.000000e+00 : f32
    %23 = vector.broadcast %cst_17 : f32 to vector<2x32xf32>
    %24 = arith.maximumf %22, %23 : vector<2x32xf32>
    %25 = arith.truncf %24 : vector<2x32xf32> to vector<2x32xbf16>
    %c0_18 = arith.constant 0 : index
    %c0_19 = arith.constant 0 : index
    %26 = vector.load %arg8[%c0_18, %c0_19] : memref<32x16xbf16, #tpu.memory_space<vmem>>, vector<32x16xbf16>
    %cst_20 = arith.constant dense<0.000000e+00> : vector<2x16xf32>
    %27 = tpu.matmul %25, %26, %cst_20 {dimension_numbers = #tpu.dot_dimension_numbers<[1], [0], [0], [1], [0, 0, 1, 1], [], []>} : vector<2x32xbf16>, vector<32x16xbf16>, vector<2x16xf32> -> vector<2x16xf32>
    %c0_21 = arith.constant 0 : index
    %c0_22 = arith.constant 0 : index
    %28 = vector.load %arg9[%c0_21, %c0_22] : memref<1x16xf32, #tpu.memory_space<vmem>>, vector<1x16xf32>
    %29 = vector.broadcast %28 : vector<1x16xf32> to vector<2x16xf32>
    %30 = arith.addf %27, %29 : vector<2x16xf32>
    %cst_23 = arith.constant 0.000000e+00 : f32
    %31 = vector.broadcast %cst_23 : f32 to vector<2x16xf32>
    %32 = arith.maximumf %30, %31 : vector<2x16xf32>
    %c0_24 = arith.constant 0 : index
    %c0_25 = arith.constant 0 : index
    %33 = vector.load %arg10[%c0_24, %c0_25] : memref<2x16xf32, #tpu.memory_space<vmem>>, vector<2x16xf32>
    tpu.vector_store %arg10[%c0_24, %c0_25], %32 {strides = array<i32>} : memref<2x16xf32, #tpu.memory_space<vmem>>, vector<2x16xf32>,
    return
  }
  func.func @transform_0(%arg0: i32) -> (i32, i32) {
    %c0_i32 = arith.constant 0 : i32
    %c0_i32_0 = arith.constant 0 : i32
    return %arg0, %c0_i32 : i32, i32
  }
  func.func @transform_1(%arg0: i32) -> (i32, i32) {
    %c0_i32 = arith.constant 0 : i32
    %c0_i32_0 = arith.constant 0 : i32
    %c0_i32_1 = arith.constant 0 : i32
    return %c0_i32, %c0_i32_0 : i32, i32
  }
  func.func @transform_2(%arg0: i32) -> (i32, i32) {
    %c0_i32 = arith.constant 0 : i32
    %c0_i32_0 = arith.constant 0 : i32
    %c0_i32_1 = arith.constant 0 : i32
    return %c0_i32, %c0_i32_0 : i32, i32
  }
  func.func @transform_3(%arg0: i32) -> (i32, i32) {
    %c0_i32 = arith.constant 0 : i32
    %c0_i32_0 = arith.constant 0 : i32
    %c0_i32_1 = arith.constant 0 : i32
    return %c0_i32, %c0_i32_0 : i32, i32
  }
  func.func @transform_4(%arg0: i32) -> (i32, i32) {
    %c0_i32 = arith.constant 0 : i32
    %c0_i32_0 = arith.constant 0 : i32
    %c0_i32_1 = arith.constant 0 : i32
    return %c0_i32, %c0_i32_0 : i32, i32
  }
  func.func @transform_5(%arg0: i32) -> (i32, i32) {
    %c0_i32 = arith.constant 0 : i32
    %c0_i32_0 = arith.constant 0 : i32
    %c0_i32_1 = arith.constant 0 : i32
    return %c0_i32, %c0_i32_0 : i32, i32
  }
  func.func @transform_6(%arg0: i32) -> (i32, i32) {
    %c0_i32 = arith.constant 0 : i32
    %c0_i32_0 = arith.constant 0 : i32
    %c0_i32_1 = arith.constant 0 : i32
    return %c0_i32, %c0_i32_0 : i32, i32
  }
  func.func @transform_7(%arg0: i32) -> (i32, i32) {
    %c0_i32 = arith.constant 0 : i32
    %c0_i32_0 = arith.constant 0 : i32
    %c0_i32_1 = arith.constant 0 : i32
    return %c0_i32, %c0_i32_0 : i32, i32
  }
  func.func @transform_8(%arg0: i32) -> (i32, i32) {
    %c0_i32 = arith.constant 0 : i32
    %c0_i32_0 = arith.constant 0 : i32
    %c0_i32_1 = arith.constant 0 : i32
    return %c0_i32, %c0_i32_0 : i32, i32
  }
  func.func @transform_9(%arg0: i32) -> (i32, i32) {
    %c0_i32 = arith.constant 0 : i32
    %c0_i32_0 = arith.constant 0 : i32
    return %arg0, %c0_i32 : i32, i32
  }
}

</mosaic_0001>

<bundles_post_ra>
// kernel: tpu_custom_call.1
= control target key start
LH: loop header
LB: loop body
LE: loop exit
PB: predicated region body
PF: predicated region fallthrough
CT: control target
= control target key end

     0   :  { %14 = vsyncpa [#allocation3], 0  ;;  %s2090_s0 = inlined_call_operand.vmem [shape: f32[2,784], index: 0, kind: input, shape index: {}]   ;;  %s2091_s1 = inlined_call_operand.hbm [shape: bf16[784,256], index: 1, kind: input, shape index: {}]   ;;  %s2092_s2 = inlined_call_operand.vmem [shape: f32[1,256], index: 2, kind: input, shape index: {}]   ;;  %s2093_s3 = inlined_call_operand.hbm [shape: bf16[256,256], index: 3, kind: input, shape index: {}]   ;;  %s2094_s4 = inlined_call_operand.vmem [shape: f32[1,256], index: 4, kind: input, shape index: {}]   ;;  %s2095_s5 = inlined_call_operand.vmem [shape: bf16[256,32], index: 5, kind: input, shape index: {}]   ;;  %s2096_s6 = inlined_call_operand.vmem [shape: f32[1,32], index: 6, kind: input, shape index: {}]   ;;  %s2097_s7 = inlined_call_operand.vmem [shape: bf16[32,16], index: 7, kind: input, shape index: {}]   ;;  %s2098_s8 = inlined_call_operand.vmem [shape: f32[1,16], index: 8, kind: input, shape index: {}]   ;;  %s2099_s9 = inlined_call_operand.hbm [shape: f32[2,16], index: 9, kind: output, shape index: {}]  }
   0x1   :  { %15 = vsyncpa [#allocation6], 0 }
   0x2   :  { %16 = vsyncpa [#allocation4], 0  ;;  %s1890_s30 = smov [#allocation2]   ;;  %s1818_s13 = scalar_lea.hbm %s2091_s1, 12544 }
   0x3   :  { %s24_s10 = sshll.u32 %s1890_s30, 4  ;;  %p1819_p0 = scmp.ne.s32.totalorder %s2091_s1, %s1818_s13  ;;  %s25_s10 = int_to_ptr.vmem [resolvable:$true] %s24_s10 }
   0x4   :  { %p1822_p1 = scmp.lt.u32.totalorder %s1818_s13, %s2091_s1 }
   0x6   :  { %p1824_p2 = pnand %p1822_p1, %p1819_p0 }
   0x8   :  { %1827 = shalt.err (!%p1824_p2)
}
   0x9   :  { %s1828_s18 = scalar_lea.vmem %s25_s10, 12544  ;;  %p1833_p4 = scmp.lt.s32.totalorder %s25_s10, %s25_s10 }
   0xa   :  { %p1829_p3 = scmp.ne.s32.totalorder %s25_s10, %s1828_s18  ;;  %p1834_p5 = scmp.lt.s32.totalorder %s1828_s18, %s1828_s18 }
   0xc   :  { %p1835_p6 = por %p1834_p5, %p1833_p4 }
   0xe   :  { %p1836_p7 = pnand %p1835_p6, %p1829_p3 }
  0x10   :  { %1839 = shalt.err (!%p1836_p7)
}
  0x11   :  { %s1891_s19 = smov 128   ;;  %s1892_s20 = smov 8  }
  0x12   :  { %30 = dma.hbm_to_vmem [thread:$0]  %s2091_s1, 12544, %s25_s10, [#allocation3], %s1891_s19, %s1891_s19, %s1892_s20  }
  0x13   :  { %s1893_s23 = smov [#allocation5]   ;;  %s1840_s27 = scalar_lea.hbm %s2093_s3, 4096 }
  0x14   :  { %s38_s24 = sshll.u32 %s1893_s23, 4  ;;  %p1841_p8 = scmp.ne.s32.totalorder %s2093_s3, %s1840_s27  ;;  %s39_s24 = int_to_ptr.vmem [resolvable:$true] %s38_s24 }
  0x15   :  { %p1844_p9 = scmp.lt.u32.totalorder %s1840_s27, %s2093_s3 }
  0x17   :  { %p1846_p10 = pnand %p1844_p9, %p1841_p8 }
  0x19   :  { %1849 = shalt.err (!%p1846_p10)
}
  0x1a   :  { %s1850_s12 = scalar_lea.vmem %s39_s24, 4096  ;;  %p1855_p12 = scmp.lt.s32.totalorder %s39_s24, %s39_s24 }
  0x1b   :  { %p1851_p11 = scmp.ne.s32.totalorder %s39_s24, %s1850_s12  ;;  %p1856_p13 = scmp.lt.s32.totalorder %s1850_s12, %s1850_s12 }
  0x1d   :  { %p1857_p0 = por %p1856_p13, %p1855_p12 }
  0x1f   :  { %p1858_p1 = pnand %p1857_p0, %p1851_p11 }
  0x21   :  { %1861 = shalt.err (!%p1858_p1)
}
  0x22   :  { %44 = dma.hbm_to_vmem [thread:$0]  %s2093_s3, 4096, %s39_s24, [#allocation6], %s1891_s19, %s1891_s19, %s1892_s20  }
  0x23   :  { %1884 = dma.done.wait [#allocation3], 12544  }
  0x24   :  { %1885 = vsyncadd [#allocation3], 4294954752 }
  0x25   :  { %1886 = dma.done.wait [#allocation6], 4096  }
  0x26   :  { %1887 = vsyncadd [#allocation6], 4294963200  ;;  %v1603_v0 = vld [vmem:[#allocation2 + $0x104] ss:$8 sps:$4 sm:$0xff]   ;;  %v1605_v1 = vld [vmem:[#allocation2 + $0x100] ss:$8 sps:$4 sm:$0xff]   ;;  %v70_v11 = vlaneseq }
  0x27   :  { %758 = vmatprep.subr.bf16.mxu0 %v1603_v0  ;;  %v1606_v2 = vld [vmem:[#allocation2 + $0x114] ss:$8 sps:$4 sm:$0xff]   ;;  %v1608_v3 = vld [vmem:[#allocation2 + $0x110] ss:$8 sps:$4 sm:$0xff]   ;;  %v1609_v4 = vld [vmem:[#allocation2 + $0x124] ss:$8 sps:$4 sm:$0xff]  }
  0x28   :  { %759 = vmatpush1.bf16.msra.mxu0 %v1605_v1  ;;  %v1611_v5 = vld [vmem:[#allocation2 + $0x120] ss:$8 sps:$4 sm:$0xff]   ;;  %v1612_v6 = vld [vmem:[#allocation2 + $0x134] ss:$8 sps:$4 sm:$0xff]   ;;  %v1614_v7 = vld [vmem:[#allocation2 + $0x130] ss:$8 sps:$4 sm:$0xff]  }
  0x29   :  { %760 = vmatprep.subr.bf16.mxu0 %v1606_v2  ;;  %v1615_v8 = vld [vmem:[#allocation2 + $0x144] ss:$8 sps:$4 sm:$0xff]   ;;  %v1894_v9 = vmov 1983009808   ;;  %v1617_v12 = vld [vmem:[#allocation2 + $0x140] ss:$8 sps:$4 sm:$0xff]  }
  0x2a   :  { %v68_v10 = vunpack.c.l.s4 %v1894_v9  ;;  %v1618_v13 = vld [vmem:[#allocation2 + $0x154] ss:$8 sps:$4 sm:$0xff]   ;;  %v1973_v15 = vshrl.u32 %v70_v11, 7  ;;  %v1620_v16 = vld [vmem:[#allocation2 + $0x150] ss:$8 sps:$4 sm:$0xff]   ;;  %v62_v19 = vld [vmem:[%s2090_s0] sm:$0xff] }
  0x2b   :  { %v1621_v17 = vld [vmem:[#allocation2 + $0x164] ss:$8 sps:$4 sm:$0xff]   ;;  %v66_v20 = vcombine.high %v62_v19, %v62_v19  ;;  %v1623_v22 = vld [vmem:[#allocation2 + $0x160] ss:$8 sps:$4 sm:$0xff]   ;;  %v1624_v23 = vld [vmem:[#allocation2 + $0x174] ss:$8 sps:$4 sm:$0xff]  }
  0x2c   :  { %761 = vmatpush1.bf16.msra.mxu0 %v1608_v3  ;;  %v69_v14 = vunpack.c.0.s8 %v68_v10  ;;  %v1658_v26 = vld [vmem:[#allocation2 + $0x4] ss:$8 sps:$4 sm:$0xff]   ;;  %v1626_v27 = vld [vmem:[#allocation2 + $0x170] ss:$8 sps:$4 sm:$0xff]   ;;  %v1663_v29 = vld [vmem:[#allocation2] ss:$8 sps:$4 sm:$0xff]  }
  0x2d   :  { %762 = vmatprep.subr.bf16.mxu0 %v1609_v4  ;;  %717 = vmatprep.subr.bf16.mxu1 %v1658_v26  ;;  %v1664_v31 = vld [vmem:[#allocation2 + $0x14] ss:$8 sps:$4 sm:$0xff]   ;;  %v1627_v32 = vld [vmem:[#allocation2 + $0x184] ss:$8 sps:$4 sm:$0xff]   ;;  %v1669_v34 = vld [vmem:[#allocation2 + $0x10] ss:$8 sps:$4 sm:$0xff]  }
  0x2e   :  { %v1976_v18 = vsub.s32 %v69_v14, %v1973_v15  ;;  %718 = vmatpush1.bf16.msra.mxu1 %v1663_v29  ;;  %v1670_v35 = vld [vmem:[#allocation2 + $0x24] ss:$8 sps:$4 sm:$0xff]   ;;  %v1629_v36 = vld [vmem:[#allocation2 + $0x180] ss:$8 sps:$4 sm:$0xff]   ;;  %v1630_v37 = vld [vmem:[#allocation2 + $0x194] ss:$8 sps:$4 sm:$0xff]  }
  0x2f   :  { %719 = vmatprep.subr.bf16.mxu1 %v1664_v31  ;;  %v1675_v38 = vld [vmem:[#allocation2 + $0x20] ss:$8 sps:$4 sm:$0xff]   ;;  %v1676_v39 = vld [vmem:[#allocation2 + $0x34] ss:$8 sps:$4 sm:$0xff]   ;;  %v1632_v40 = vld [vmem:[#allocation2 + $0x190] ss:$8 sps:$4 sm:$0xff]  }
  0x30   :  { %763 = vmatpush1.bf16.msra.mxu0 %v1611_v5  ;;  %v1982_v21 = vrot.slane %v62_v19, %v1976_v18  ;;  %v1985_v24 = vrot.slane %v66_v20, %v1976_v18  ;;  %v1633_v41 = vld [vmem:[#allocation2 + $0x1a4] ss:$8 sps:$4 sm:$0xff]   ;;  %v1681_v42 = vld [vmem:[#allocation2 + $0x30] ss:$8 sps:$4 sm:$0xff]   ;;  %v1635_v44 = vld [vmem:[#allocation2 + $0x1a0] ss:$8 sps:$4 sm:$0xff]  }
  0x31   :  { %764 = vmatprep.subr.bf16.mxu0 %v1612_v6  ;;  %v1682_v43 = vld [vmem:[#allocation2 + $0x44] ss:$8 sps:$4 sm:$0xff]   ;;  %v1636_v45 = vld [vmem:[#allocation2 + $0x1b4] ss:$8 sps:$4 sm:$0xff]   ;;  %v1687_v46 = vld [vmem:[#allocation2 + $0x40] ss:$8 sps:$4 sm:$0xff]  }
  0x32   :  { %v81_v25 = vcombine.high %v1982_v21, %v1982_v21  ;;  %v82_v28 = vcombine.high %v1985_v24, %v1985_v24  ;;  %720 = vmatpush1.bf16.msra.mxu1 %v1669_v34  ;;  %v1688_v47 = vld [vmem:[#allocation2 + $0x54] ss:$8 sps:$4 sm:$0xff]   ;;  %v1638_v48 = vld [vmem:[#allocation2 + $0x1b0] ss:$8 sps:$4 sm:$0xff]   ;;  %v1639_v49 = vld [vmem:[#allocation2 + $0x1c4] ss:$8 sps:$4 sm:$0xff]   ;;  %v108_v5 = vpack.c.bf16 %v1985_v24, %v1985_v24 }
  0x33   :  { %721 = vmatprep.subr.bf16.mxu1 %v1670_v35  ;;  %v1693_v50 = vld [vmem:[#allocation2 + $0x50] ss:$8 sps:$4 sm:$0xff]   ;;  %v1694_v51 = vld [vmem:[#allocation2 + $0x64] ss:$8 sps:$4 sm:$0xff]   ;;  %v1641_v52 = vld [vmem:[#allocation2 + $0x1c0] ss:$8 sps:$4 sm:$0xff]  }
  0x34   :  { %765 = vmatpush1.bf16.msra.mxu0 %v1614_v7  ;;  %v107_v30 = vpack.c.bf16 %v81_v25, %v81_v25  ;;  %v109_v33 = vpack.c.bf16 %v82_v28, %v82_v28  ;;  %v1642_v53 = vld [vmem:[#allocation2 + $0x1d4] ss:$8 sps:$4 sm:$0xff]   ;;  %v1699_v54 = vld [vmem:[#allocation2 + $0x60] ss:$8 sps:$4 sm:$0xff]   ;;  %v1644_v56 = vld [vmem:[#allocation2 + $0x1d0] ss:$8 sps:$4 sm:$0xff]  }
  0x35   :  { %766 = vmatprep.subr.bf16.mxu0 %v1615_v8  ;;  %v1700_v55 = vld [vmem:[#allocation2 + $0x74] ss:$8 sps:$4 sm:$0xff]   ;;  %v1645_v57 = vld [vmem:[#allocation2 + $0x1e4] ss:$8 sps:$4 sm:$0xff]   ;;  %v1705_v58 = vld [vmem:[#allocation2 + $0x70] ss:$8 sps:$4 sm:$0xff]  }
  0x36   :  { %749 = vmatprep.mubr.bf16.mxu1 %v107_v30  ;;  %790 = vmatprep.mubr.bf16.mxu0 %v109_v33  ;;  %v1706_v59 = vld [vmem:[#allocation2 + $0x84] ss:$8 sps:$4 sm:$0xff]   ;;  %v1647_v60 = vld [vmem:[#allocation2 + $0x1e0] ss:$8 sps:$4 sm:$0xff]   ;;  %v1648_v61 = vld [vmem:[#allocation2 + $0x1f4] ss:$8 sps:$4 sm:$0xff]  }
  0x37   :  { %722 = vmatpush1.bf16.msra.mxu1 %v1675_v38  ;;  %v1711_v62 = vld [vmem:[#allocation2 + $0x80] ss:$8 sps:$4 sm:$0xff]   ;;  %v1712_v63 = vld [vmem:[#allocation2 + $0x94] ss:$8 sps:$4 sm:$0xff]   ;;  %v1650_v0 = vld [vmem:[#allocation2 + $0x1f0] ss:$8 sps:$4 sm:$0xff]  }
  0x38   :  { %767 = vmatpush1.bf16.msra.mxu0 %v1617_v12  ;;  %723 = vmatprep.subr.bf16.mxu1 %v1676_v39  ;;  %v1654_v1 = vld [vmem:[#allocation2 + $0x204] ss:$8 sps:$4 sm:$0xff]   ;;  %v1717_v2 = vld [vmem:[#allocation2 + $0x90] ss:$8 sps:$4 sm:$0xff]   ;;  %v1652_v8 = vld [vmem:[#allocation2 + $0x200] ss:$8 sps:$4 sm:$0xff]  }
  0x39   :  { %768 = vmatprep.subr.bf16.mxu0 %v1618_v13  ;;  %v1718_v3 = vld [vmem:[#allocation2 + $0xa4] ss:$8 sps:$4 sm:$0xff]   ;;  %v1657_v9 = vld [vmem:[#allocation2 + $0x214] ss:$8 sps:$4 sm:$0xff]   ;;  %v1723_v10 = vld [vmem:[#allocation2 + $0xa0] ss:$8 sps:$4 sm:$0xff]  }
  0x3a   :  { %v63_v4 = vld [vmem:[%s2090_s0 + $0x8] sm:$0x3f]  ;;  %v1724_v13 = vld [vmem:[#allocation2 + $0xb4] ss:$8 sps:$4 sm:$0xff]   ;;  %v1729_v19 = vld [vmem:[#allocation2 + $0xb0] ss:$8 sps:$4 sm:$0xff]  }
  0x3b   :  { %724 = vmatpush1.bf16.msra.mxu1 %v1681_v42  ;;  %v83_v6 = vcombine.high %v63_v4, %v63_v4  ;;  %v1997_v7 = vrot.slane %v63_v4, %v1976_v18  ;;  %v1730_v20 = vld [vmem:[#allocation2 + $0xc4] ss:$8 sps:$4 sm:$0xff]   ;;  %v1736_v24 = vld [vmem:[#allocation2 + $0xd4] ss:$8 sps:$4 sm:$0xff]   ;;  %v1666_v25 = vld [vmem:[#allocation2 + $0x230] ss:$8 sps:$4 sm:$0xff]  }
  0x3c   :  { %769 = vmatpush1.bf16.msra.mxu0 %v1620_v16  ;;  %725 = vmatprep.subr.bf16.mxu1 %v1682_v43  ;;  %v1655_v16 = vld [vmem:[#allocation2 + $0x210] ss:$8 sps:$4 sm:$0xff]   ;;  %v1674_v26 = vld [vmem:[#allocation2 + $0x244] ss:$8 sps:$4 sm:$0xff]   ;;  %v1672_v29 = vld [vmem:[#allocation2 + $0x240] ss:$8 sps:$4 sm:$0xff]  }
  0x3d   :  { %770 = vmatprep.subr.bf16.mxu0 %v1621_v17  ;;  %v2000_v11 = vrot.slane %v83_v6, %v1976_v18  ;;  %v98_v12 = vcombine.high %v1997_v7, %v1997_v7  ;;  %v1662_v17 = vld [vmem:[#allocation2 + $0x224] ss:$8 sps:$4 sm:$0xff]   ;;  %v1668_v18 = vld [vmem:[#allocation2 + $0x234] ss:$8 sps:$4 sm:$0xff]   ;;  %v1748_v31 = vld [vmem:[#allocation2 + $0xe0] ss:$8 sps:$4 sm:$0xff]  }
  0x3e   :  { %v1743_v28 = vld [vmem:[#allocation2 + $0xe4] ss:$8 sps:$4 sm:$0xff]   ;;  %v1680_v30 = vld [vmem:[#allocation2 + $0x254] ss:$8 sps:$4 sm:$0xff]   ;;  %v1751_v35 = vld [vmem:[#allocation2 + $0xf0] ss:$8 sps:$4 sm:$0xff]  }
  0x3f   :  { %726 = vmatpush1.bf16.msra.mxu1 %v1687_v46  ;;  %v111_v14 = vpack.c.bf16 %v98_v12, %v98_v12  ;;  %v1749_v33 = vld [vmem:[#allocation2 + $0xf4] ss:$8 sps:$4 sm:$0xff]   ;;  %v1686_v34 = vld [vmem:[#allocation2 + $0x264] ss:$8 sps:$4 sm:$0xff]   ;;  %v1752_v39 = vld [vmem:[#allocation5] ss:$8 sps:$4 sm:$0xff]  }
  0x40   :  { %771 = vmatpush1.bf16.msra.mxu0 %v1623_v22  ;;  %727 = vmatprep.subr.bf16.mxu1 %v1688_v47  ;;  %v1660_v22 = vld [vmem:[#allocation2 + $0x220] ss:$8 sps:$4 sm:$0xff]   ;;  %v1692_v38 = vld [vmem:[#allocation2 + $0x274] ss:$8 sps:$4 sm:$0xff]   ;;  %v1690_v42 = vld [vmem:[#allocation2 + $0x270] ss:$8 sps:$4 sm:$0xff]  }
  0x41   :  { %772 = vmatprep.subr.bf16.mxu0 %v1624_v23  ;;  %v1735_v23 = vld [vmem:[#allocation2 + $0xc0] ss:$8 sps:$4 sm:$0xff]   ;;  %v1698_v43 = vld [vmem:[#allocation2 + $0x284] ss:$8 sps:$4 sm:$0xff]   ;;  %v1704_v47 = vld [vmem:[#allocation2 + $0x294] ss:$8 sps:$4 sm:$0xff]  }
  0x42   :  { %v1696_v46 = vld [vmem:[#allocation2 + $0x280] ss:$8 sps:$4 sm:$0xff]   ;;  %v1778_v4 = vld [vmem:[#allocation5 + $0x84] ss:$8 sps:$4 sm:$0xff]   ;;  %v1747_v12 = vld [vmem:[#allocation2 + $0x304] ss:$8 sps:$4 sm:$0xff]  }
  0x43   :  { %728 = vmatpush1.bf16.msra.mxu1 %v1693_v50  ;;  %v1710_v50 = vld [vmem:[#allocation2 + $0x2a4] ss:$8 sps:$4 sm:$0xff]   ;;  %v1740_v6 = vld [vmem:[#allocation2 + $0x2f4] ss:$8 sps:$4 sm:$0xff]   ;;  %vm713_vm0 = vcmask 130048   ;;  %vm1897_vm1 = vmmov 0  }
  0x44   :  { %773 = vmatpush1.bf16.msra.mxu0 %v1626_v27  ;;  %729 = vmatprep.subr.bf16.mxu1 %v1694_v51  ;;  %v1741_v27 = vld [vmem:[#allocation2 + $0xd0] ss:$8 sps:$4 sm:$0xff]   ;;  %v1761_v51 = vld [vmem:[#allocation5 + $0x30] ss:$8 sps:$4 sm:$0xff]   ;;  %vm1334_vm2 = vcmask 261120   ;;  %vm1379_vm3 = vcmask 123904  }
  0x45   :  { %774 = vmatprep.subr.bf16.mxu0 %v1627_v32  ;;  %v1678_v32 = vld [vmem:[#allocation2 + $0x250] ss:$8 sps:$4 sm:$0xff]  }
  0x47   :  { %730 = vmatpush1.bf16.msra.mxu1 %v1699_v54  ;;  %v1716_v54 = vld [vmem:[#allocation2 + $0x2b4] ss:$8 sps:$4 sm:$0xff]  }
  0x48   :  { %775 = vmatpush1.bf16.msra.mxu0 %v1629_v36  ;;  %731 = vmatprep.subr.bf16.mxu1 %v1700_v55  ;;  %v1754_v36 = vld [vmem:[#allocation5 + $0x4] ss:$8 sps:$4 sm:$0xff]   ;;  %v1764_v55 = vld [vmem:[#allocation5 + $0x40] ss:$8 sps:$4 sm:$0xff]  }
  0x49   :  { %776 = vmatprep.subr.bf16.mxu0 %v1630_v37  ;;  %v1684_v37 = vld [vmem:[#allocation2 + $0x260] ss:$8 sps:$4 sm:$0xff]  }
  0x4b   :  { %732 = vmatpush1.bf16.msra.mxu1 %v1705_v58  ;;  %v1722_v58 = vld [vmem:[#allocation2 + $0x2c4] ss:$8 sps:$4 sm:$0xff]  }
  0x4c   :  { %777 = vmatpush1.bf16.msra.mxu0 %v1632_v40  ;;  %733 = vmatprep.subr.bf16.mxu1 %v1706_v59  ;;  %v106_v40 = vpack.c.bf16 %v1982_v21, %v1982_v21  ;;  %v1763_v21 = vld [vmem:[#allocation5 + $0x34] ss:$8 sps:$4 sm:$0xff]   ;;  %v1767_v59 = vld [vmem:[#allocation5 + $0x50] ss:$8 sps:$4 sm:$0xff]  }
  0x4d   :  { %778 = vmatprep.subr.bf16.mxu0 %v1633_v41  ;;  %v1757_v41 = vld [vmem:[#allocation5 + $0x14] ss:$8 sps:$4 sm:$0xff]  }
  0x4f   :  { %734 = vmatpush1.bf16.msra.mxu1 %v1711_v62  ;;  %v1728_v62 = vld [vmem:[#allocation2 + $0x2d4] ss:$8 sps:$4 sm:$0xff]  }
  0x50   :  { %779 = vmatpush1.bf16.msra.mxu0 %v1635_v44  ;;  %735 = vmatprep.subr.bf16.mxu1 %v1712_v63  ;;  %v1755_v44 = vld [vmem:[#allocation5 + $0x10] ss:$8 sps:$4 sm:$0xff]   ;;  %v1770_v63 = vld [vmem:[#allocation5 + $0x60] ss:$8 sps:$4 sm:$0xff]  }
  0x51   :  { %780 = vmatprep.subr.bf16.mxu0 %v1636_v45  ;;  %v1760_v45 = vld [vmem:[#allocation5 + $0x24] ss:$8 sps:$4 sm:$0xff]  }
  0x53   :  { %736 = vmatpush1.bf16.msra.mxu1 %v1717_v2  ;;  %v1734_v2 = vld [vmem:[#allocation2 + $0x2e4] ss:$8 sps:$4 sm:$0xff]  }
  0x54   :  { %781 = vmatpush1.bf16.msra.mxu0 %v1638_v48  ;;  %737 = vmatprep.subr.bf16.mxu1 %v1718_v3  ;;  %v1758_v48 = vld [vmem:[#allocation5 + $0x20] ss:$8 sps:$4 sm:$0xff]   ;;  %v1773_v3 = vld [vmem:[#allocation5 + $0x70] ss:$8 sps:$4 sm:$0xff]  }
  0x55   :  { %782 = vmatprep.subr.bf16.mxu0 %v1639_v49  ;;  %v1702_v49 = vld [vmem:[#allocation2 + $0x290] ss:$8 sps:$4 sm:$0xff]  }
  0x57   :  { %738 = vmatpush1.bf16.msra.mxu1 %v1723_v10  ;;  %v1738_v10 = vld [vmem:[#allocation2 + $0x2f0] ss:$8 sps:$4 sm:$0xff]  }
  0x58   :  { %783 = vmatpush1.bf16.msra.mxu0 %v1641_v52  ;;  %739 = vmatprep.subr.bf16.mxu1 %v1724_v13  ;;  %v1766_v52 = vld [vmem:[#allocation5 + $0x44] ss:$8 sps:$4 sm:$0xff]   ;;  %v1779_v13 = vld [vmem:[#allocation5 + $0x90] ss:$8 sps:$4 sm:$0xff]  }
  0x59   :  { %784 = vmatprep.subr.bf16.mxu0 %v1642_v53  ;;  %v1708_v53 = vld [vmem:[#allocation2 + $0x2a0] ss:$8 sps:$4 sm:$0xff]  }
  0x5b   :  { %740 = vmatpush1.bf16.msra.mxu1 %v1729_v19  ;;  %v1782_v19 = vld [vmem:[#allocation5 + $0xa0] ss:$8 sps:$4 sm:$0xff]  }
  0x5c   :  { %785 = vmatpush1.bf16.msra.mxu0 %v1644_v56  ;;  %741 = vmatprep.subr.bf16.mxu1 %v1730_v20  ;;  %v1769_v56 = vld [vmem:[#allocation5 + $0x54] ss:$8 sps:$4 sm:$0xff]  }
  0x5d   :  { %786 = vmatprep.subr.bf16.mxu0 %v1645_v57  ;;  %v1714_v57 = vld [vmem:[#allocation2 + $0x2b0] ss:$8 sps:$4 sm:$0xff]   ;;  %v1787_v20 = vld [vmem:[#allocation5 + $0xb4] ss:$8 sps:$4 sm:$0xff]  }
  0x5f   :  { %742 = vmatpush1.bf16.msra.mxu1 %v1735_v23  ;;  %v1790_v23 = vld [vmem:[#allocation5 + $0xc4] ss:$8 sps:$4 sm:$0xff]  }
  0x60   :  { %787 = vmatpush1.bf16.msra.mxu0 %v1647_v60  ;;  %743 = vmatprep.subr.bf16.mxu1 %v1736_v24  ;;  %v1772_v60 = vld [vmem:[#allocation5 + $0x64] ss:$8 sps:$4 sm:$0xff]   ;;  %v1788_v24 = vld [vmem:[#allocation5 + $0xc0] ss:$8 sps:$4 sm:$0xff]  }
  0x61   :  { %788 = vmatprep.subr.bf16.mxu0 %v1648_v61  ;;  %v1720_v61 = vld [vmem:[#allocation2 + $0x2c0] ss:$8 sps:$4 sm:$0xff]  }
  0x63   :  { %744 = vmatpush1.bf16.msra.mxu1 %v1741_v27  ;;  %v1796_v27 = vld [vmem:[#allocation5 + $0xe4] ss:$8 sps:$4 sm:$0xff]  }
  0x64   :  { %789 = vmatpush1.bf16.msra.mxu0 %v1650_v0  ;;  %745 = vmatprep.subr.bf16.mxu1 %v1743_v28  ;;  %v1775_v0 = vld [vmem:[#allocation5 + $0x74] ss:$8 sps:$4 sm:$0xff]   ;;  %v1794_v28 = vld [vmem:[#allocation5 + $0xe0] ss:$8 sps:$4 sm:$0xff]  }
  0x65   :  { %799 = vmatprep.subr.bf16.mxu0 %v1654_v1  ;;  %v1726_v1 = vld [vmem:[#allocation2 + $0x2d0] ss:$8 sps:$4 sm:$0xff]  }
  0x67   :  { %791 = vmatmul.mubr.bf16.vlgmr.msra.gmra.mrb[0].mxu0 %v108_v5  ;;  %746 = vmatpush1.bf16.msra.mxu1 %v1748_v31  ;;  %v1732_v5 = vld [vmem:[#allocation2 + $0x2e0] ss:$8 sps:$4 sm:$0xff]  }
  0x68   :  { %800 = vmatpush1.bf16.msra.mxu0 %v1652_v8  ;;  %831 = vmatprep.mubr.bf16.mxu0 %v111_v14  ;;  %v1776_v8 = vld [vmem:[#allocation5 + $0x80] ss:$8 sps:$4 sm:$0xff]   ;;  %v1784_v14 = vld [vmem:[#allocation5 + $0xa4] ss:$8 sps:$4 sm:$0xff]   ;;  %v1800_v31 = vld [vmem:[%s2095_s5 + $0x40] sm:$0xff]  }
  0x69   :  { %801 = vmatprep.subr.bf16.mxu0 %v1657_v9  ;;  %747 = vmatprep.subr.bf16.mxu1 %v1749_v33  ;;  %v1781_v9 = vld [vmem:[#allocation5 + $0x94] ss:$8 sps:$4 sm:$0xff]  }
  0x6b   :  { %748 = vmatpush1.bf16.msra.mxu1 %v1751_v35  ;;  %v215_v35 = vsub.s32 0, %v1973_v15 }
  0x6c   :  { %802 = vmatpush1.bf16.msra.mxu0 %v1655_v16  ;;  %1089 = vmatprep.subr.bf16.mxu1 %v1754_v36  ;;  %v110_v16 = vpack.c.bf16 %v1997_v7, %v1997_v7  ;;  %v112_v7 = vpack.c.bf16 %v2000_v11, %v2000_v11  ;;  %v211_v36 = vld [vmem:[%s2092_s2] sm:$0x3] }
  0x6d   :  { %803 = vmatprep.subr.bf16.mxu0 %v1662_v17  ;;  %v1745_v17 = vld [vmem:[#allocation2 + $0x300] ss:$8 sps:$4 sm:$0xff]  }
  0x6e   :  { %750 = vmatmul.mubr.bf16.vlgmr.msra.gmra.mrb[0].mxu1 %v106_v40 }
  0x6f   :  { %1090 = vmatpush1.bf16.msra.mxu1 %v1752_v39 }
  0x70   :  { %804 = vmatpush1.bf16.msra.mxu0 %v1660_v22  ;;  %1091 = vmatprep.subr.bf16.mxu1 %v1757_v41  ;;  %v1895_v22 = vmov 0  }
  0x71   :  { %805 = vmatprep.subr.bf16.mxu0 %v1668_v18  ;;  %v1785_v18 = vld [vmem:[#allocation5 + $0xb0] ss:$8 sps:$4 sm:$0xff]  }
  0x73   :  { %1092 = vmatpush1.bf16.msra.mxu1 %v1755_v44 }
  0x74   :  { %806 = vmatpush1.bf16.msra.mxu0 %v1666_v25  ;;  %1093 = vmatprep.subr.bf16.mxu1 %v1760_v45  ;;  %v1791_v25 = vld [vmem:[#allocation5 + $0xd0] ss:$8 sps:$4 sm:$0xff]  }
  0x75   :  { %807 = vmatprep.subr.bf16.mxu0 %v1674_v26  ;;  %v1793_v26 = vld [vmem:[#allocation5 + $0xd4] ss:$8 sps:$4 sm:$0xff]  }
  0x77   :  { %1094 = vmatpush1.bf16.msra.mxu1 %v1758_v48 }
  0x78   :  { %808 = vmatpush1.bf16.msra.mxu0 %v1672_v29  ;;  %1095 = vmatprep.subr.bf16.mxu1 %v1763_v21  ;;  %v1799_v29 = vld [vmem:[#allocation5 + $0xf4] ss:$8 sps:$4 sm:$0xff]  }
  0x79   :  { %809 = vmatprep.subr.bf16.mxu0 %v1680_v30  ;;  %v1797_v30 = vld [vmem:[#allocation5 + $0xf0] ss:$8 sps:$4 sm:$0xff]  }
  0x7b   :  { %1096 = vmatpush1.bf16.msra.mxu1 %v1761_v51 }
  0x7c   :  { %810 = vmatpush1.bf16.msra.mxu0 %v1678_v32  ;;  %1097 = vmatprep.subr.bf16.mxu1 %v1766_v52  ;;  %v1803_v52 = vld [vmem:[%s2095_s5 + $0x8] sm:$0xff]  }
  0x7d   :  { %811 = vmatprep.subr.bf16.mxu0 %v1686_v34 }
  0x7f   :  { %1098 = vmatpush1.bf16.msra.mxu1 %v1764_v55  ;;  %v1806_v55 = vld [vmem:[%s2095_s5 + $0x58] sm:$0xff]  }
  0x80   :  { %812 = vmatpush1.bf16.msra.mxu0 %v1684_v37  ;;  %1099 = vmatprep.subr.bf16.mxu1 %v1769_v56  ;;  %v219_v37 = vsub.s32 1, %v1973_v15  ;;  %v1802_v15 = vld [vmem:[%s2095_s5 + $0x48] sm:$0xff]   ;;  %v1807_v56 = vld [vmem:[%s2095_s5 + $0x18] sm:$0xff]  }
  0x81   :  { %813 = vmatprep.subr.bf16.mxu0 %v1692_v38  ;;  %v216_v38 = vrot.slane %v211_v36, %v215_v35 }
  0x82   :  { %v220_v39 = vrot.slane %v211_v36, %v219_v37 }
  0x83   :  { %1100 = vmatpush1.bf16.msra.mxu1 %v1767_v59  ;;  %v1810_v59 = vld [vmem:[%s2095_s5 + $0x68] sm:$0xff]  }
  0x84   :  { %814 = vmatpush1.bf16.msra.mxu0 %v1690_v42  ;;  %1101 = vmatprep.subr.bf16.mxu1 %v1772_v60  ;;  %v1811_v60 = vld [vmem:[%s2095_s5 + $0x28] sm:$0xff]  }
  0x85   :  { %815 = vmatprep.subr.bf16.mxu0 %v1698_v43 }
  0x87   :  { %1102 = vmatpush1.bf16.msra.mxu1 %v1770_v63  ;;  %v1814_v63 = vld [vmem:[%s2095_s5 + $0x78] sm:$0xff]  }
  0x88   :  { %816 = vmatpush1.bf16.msra.mxu0 %v1696_v46  ;;  %1103 = vmatprep.subr.bf16.mxu1 %v1775_v0  ;;  %v1815_v0 = vld [vmem:[%s2095_s5 + $0x38] sm:$0xff]  }
  0x89   :  { %817 = vmatprep.subr.bf16.mxu0 %v1704_v47 }
  0x8b   :  { %1104 = vmatpush1.bf16.msra.mxu1 %v1773_v3 }
  0x8c   :  { %818 = vmatpush1.bf16.msra.mxu0 %v1702_v49  ;;  %1105 = vmatprep.subr.bf16.mxu1 %v1778_v4 }
  0x8d   :  { %819 = vmatprep.subr.bf16.mxu0 %v1710_v50  ;;  %v1801_v50 = vld [vmem:[%s2095_s5] sm:$0xff]  }
  0x8f   :  { %1106 = vmatpush1.bf16.msra.mxu1 %v1776_v8 }
  0x90   :  { %820 = vmatpush1.bf16.msra.mxu0 %v1708_v53  ;;  %1107 = vmatprep.subr.bf16.mxu1 %v1781_v9  ;;  %v1804_v53 = vld [vmem:[%s2095_s5 + $0x50] sm:$0xff]  }
  0x91   :  { %821 = vmatprep.subr.bf16.mxu0 %v1716_v54  ;;  %v1805_v54 = vld [vmem:[%s2095_s5 + $0x10] sm:$0xff]  }
  0x93   :  { %1108 = vmatpush1.bf16.msra.mxu1 %v1779_v13 }
  0x94   :  { %822 = vmatpush1.bf16.msra.mxu0 %v1714_v57  ;;  %1109 = vmatprep.subr.bf16.mxu1 %v1784_v14  ;;  %v1808_v57 = vld [vmem:[%s2095_s5 + $0x60] sm:$0xff]  }
  0x95   :  { %823 = vmatprep.subr.bf16.mxu0 %v1722_v58  ;;  %v1809_v58 = vld [vmem:[%s2095_s5 + $0x20] sm:$0xff]  }
  0x97   :  { %1110 = vmatpush1.bf16.msra.mxu1 %v1782_v19  ;;  %v1896_v19 = vmov 0.0  }
  0x98   :  { %824 = vmatpush1.bf16.msra.mxu0 %v1720_v61  ;;  %1111 = vmatprep.subr.bf16.mxu1 %v1787_v20  ;;  %v1812_v61 = vld [vmem:[%s2095_s5 + $0x70] sm:$0xff]   ;;  %v1817_v20 = vld [vmem:[%s2097_s7 + $0x8] sm:$0xff]  }
  0x99   :  { %825 = vmatprep.subr.bf16.mxu0 %v1728_v62  ;;  %v1813_v62 = vld [vmem:[%s2095_s5 + $0x30] sm:$0xff]  }
  0x9b   :  { %1112 = vmatpush1.bf16.msra.mxu1 %v1785_v18  ;;  %v1528_v18 = vld [vmem:[%s2096_s6] ss:$0 sm:$0xff] }
  0x9c   :  { %826 = vmatpush1.bf16.msra.mxu0 %v1726_v1  ;;  %1113 = vmatprep.subr.bf16.mxu1 %v1790_v23  ;;  %v917_v1 = vld [vmem:[%s2094_s4] sm:$0x3] }
  0x9d   :  { %827 = vmatprep.subr.bf16.mxu0 %v1734_v2  ;;  %v922_v2 = vrot.slane %v917_v1, %v215_v35  ;;  %v926_v3 = vrot.slane %v917_v1, %v219_v37 }
  0x9f   :  { %1114 = vmatpush1.bf16.msra.mxu1 %v1788_v24 }
  0xa0   :  { %828 = vmatpush1.bf16.msra.mxu0 %v1732_v5  ;;  %1115 = vmatprep.subr.bf16.mxu1 %v1793_v26 }
  0xa1   :  { %829 = vmatprep.subr.bf16.mxu0 %v1740_v6 }
  0xa3   :  { %1116 = vmatpush1.bf16.msra.mxu1 %v1791_v25 }
  0xa4   :  { %830 = vmatpush1.bf16.msra.mxu0 %v1738_v10  ;;  %1117 = vmatprep.subr.bf16.mxu1 %v1796_v27 }
  0xa5   :  { %840 = vmatprep.subr.bf16.mxu0 %v1747_v12 }
  0xa7   :  { %832 = vmatmul.mubr.bf16.vlgmr.msra.gmra.mrb[0].mxu0 %v110_v16  ;;  %1118 = vmatpush1.bf16.msra.mxu1 %v1794_v28 }
  0xa8   :  { %841 = vmatpush1.bf16.msra.mxu0 %v1745_v17  ;;  %872 = vmatprep.mubr.bf16.mxu0 %v1895_v22  ;;  %v1816_v17 = vld [vmem:[%s2097_s7] sm:$0xff]   ;;  %s1898_s7 = smov [#allocation7]  }
  0xa9   :  { %1119 = vmatprep.subr.bf16.mxu1 %v1799_v29  ;;  %1574 = vmatprep.subr.bf16.mxu0 %v1896_v19  ;;  %v1545_v29 = vld [vmem:[%s2098_s8] ss:$0 sm:$0xff]  ;;  %s1387_s11 = sshll.u32 %s1898_s7, 4  ;;  %s1388_s11 = int_to_ptr.vmem [resolvable:$true] %s1387_s11 }
  0xaa   :  { %s1862_s6 = scalar_lea.vmem %s1388_s11, 32  ;;  %p1867_p3 = scmp.lt.s32.totalorder %s1388_s11, %s1388_s11 }
  0xab   :  { %1120 = vmatpush1.bf16.msra.mxu1 %v1797_v30  ;;  %p1863_p2 = scmp.ne.s32.totalorder %s1388_s11, %s1862_s6  ;;  %p1868_p4 = scmp.lt.s32.totalorder %s1862_s6, %s1862_s6 }
  0xac   :  { %1549 = vmatprep.subr.bf16.mxu1 %v1800_v31 }
  0xad   :  { %p1869_p5 = por %p1868_p4, %p1867_p3 }
  0xaf   :  { %p1870_p6 = pnand %p1869_p5, %p1863_p2 }
  0xb3   :  { %1495 = vmatmul.mubr.msk.bf16.vlgmr.msra.gmra.mrb[0].mxu0 %vm713_vm0, %v112_v7 }
  0xb4   :  { %1575 = vmatpush3.bf16.msra.mxu0 %v1816_v17  ;;  %1578 = vmatprep.mubr.msk.bf16.mxu0 %vm1897_vm1, %v1896_v19 }
  0xb5   :  { %1576 = vmatprep.subr.bf16.mxu0 %v1896_v19 }
  0xb8   :  { %1577 = vmatpush3.bf16.msra.mxu0 %v1817_v20 }
 0x141   :  { %v751_v11 = vpop.f32.mrb[0].mxu1 }
 0x142   :  { %v753_v32 = vpop.f32.mrb[1].mxu1  ;;  %v752_v40 = vadd.f32 %v751_v11, %v216_v38 }
 0x143   :  { %v755_v33 = vpop.f32.mrb[2].mxu1  ;;  %v754_v41 = vadd.f32 %v753_v32, %v220_v39 }
 0x144   :  { %v756_v34 = vpop.f32.mrb[3].mxu1 }
 0x186   :  { %v874_v42 = vpop.f32.mrb[0].mxu0 }
 0x187   :  { %v1583_v43 = vadd.f32 %v874_v42, %v752_v40  ;;  %v876_v44 = vpop.f32.mrb[1].mxu0 }
 0x188   :  { %v1585_v45 = vadd.f32 %v876_v44, %v754_v41  ;;  %v878_v46 = vpop.f32.mrb[2].mxu0 }
 0x189   :  { %v881_v47 = vmax.f32 %v1583_v43, 0.0  ;;  %v879_v48 = vpop.f32.mrb[3].mxu0 }
 0x18a   :  { %v882_v21 = vmax.f32 %v1585_v45, 0.0 }
 0x18b   :  { %v883_v51 = vpack.c.bf16 %v881_v47, %v881_v47 }
 0x18c   :  { %v884_v49 = vpack.c.bf16 %v882_v21, %v882_v21 }
 0x18e   :  { %1121 = vmatprep.mubr.bf16.mxu1 %v884_v49 }
 0x18f   :  { %1122 = vmatmul.mubr.bf16.vlgmr.msra.gmra.mrb[4].mxu1 %v883_v51 }
 0x190   :  { %1550 = vmatpush3.bf16.msra.mxu1 %v1801_v50 }
 0x191   :  { %1551 = vmatprep.subr.bf16.mxu1 %v1802_v15 }
 0x194   :  { %1552 = vmatpush3.bf16.msra.mxu1 %v1803_v52 }
 0x195   :  { %1553 = vmatprep.subr.bf16.mxu1 %v1804_v53 }
 0x198   :  { %1554 = vmatpush3.bf16.msra.mxu1 %v1805_v54 }
 0x199   :  { %1555 = vmatprep.subr.bf16.mxu1 %v1806_v55 }
 0x19c   :  { %1556 = vmatpush3.bf16.msra.mxu1 %v1807_v56 }
 0x19d   :  { %1557 = vmatprep.subr.bf16.mxu1 %v1808_v57 }
 0x1a0   :  { %1558 = vmatpush3.bf16.msra.mxu1 %v1809_v58 }
 0x1a1   :  { %1559 = vmatprep.subr.bf16.mxu1 %v1810_v59 }
 0x1a4   :  { %1560 = vmatpush3.bf16.msra.mxu1 %v1811_v60 }
 0x1a5   :  { %1561 = vmatprep.subr.bf16.mxu1 %v1812_v61 }
 0x1a8   :  { %1562 = vmatpush3.bf16.msra.mxu1 %v1813_v62 }
 0x1a9   :  { %1563 = vmatprep.subr.bf16.mxu1 %v1814_v63 }
 0x1ac   :  { %1564 = vmatpush3.bf16.msra.mxu1 %v1815_v0 }
 0x262   :  { %v1123_v4 = vpop.f32.mrb[4].mxu1 }
 0x263   :  { %v1124_v5 = vadd.f32 %v1123_v4, %v922_v2  ;;  %v1125_v6 = vpop.f32.mrb[5].mxu1 }
 0x264   :  { %v1126_v8 = vadd.f32 %v1125_v6, %v926_v3  ;;  %v1127_v9 = vpop.f32.mrb[6].mxu1 }
 0x265   :  { %v1130_v10 = vmax.f32 %v1124_v5, 0.0  ;;  %v1128_v12 = vpop.f32.mrb[7].mxu1 }
 0x266   :  { %v1131_v13 = vmax.f32 %v1126_v8, 0.0 }
 0x267   :  { %v1132_v16 = vpack.c.bf16 %v1130_v10, %v1130_v10 }
 0x268   :  { %v1133_v14 = vpack.c.bf16 %v1131_v13, %v1131_v13 }
 0x26a   :  { %1301 = vmatprep.mubr.bf16.mxu1 %v1133_v14 }
 0x26b   :  { %1302 = vmatmul.mubr.bf16.vlgmr.msra.gmra.mrb[8].mxu1 %v1132_v16 }
 0x33e   :  { %v1565_v22 = vpop.f32.mrb[8].mxu1 }
 0x33f   :  { %v1566_v23 = vpop.f32.mrb[9].mxu1 }
 0x340   :  { %v1567_v24 = vadd.f32 %v1566_v23, %v1565_v22  ;;  %v1568_v7 = vpop.f32.mrb[10].mxu1 }
 0x341   :  { %v1569_v25 = vpop.f32.mrb[11].mxu1 }
 0x342   :  { %v1304_v26 = vadd.f32 %v1567_v24, %v1528_v18 }
 0x344   :  { %v1309_v27 = vmax.f32 %v1304_v26, 0.0 }
 0x346   :  { %v1310_v28 = vpack.c.bf16 %v1309_v27, %v1309_v27 }
 0x348   :  { %1579 = vmatmul.mubr.msk.bf16.vlgmr.msra.gmra.mrb[4].mxu0 %vm1334_vm2, %v1310_v28 }
 0x41b   :  { %v1372_v30 = vpop.f32.mrb[4].mxu0 }
 0x41c   :  { %v1373_v31 = vadd.f32 %v1545_v29, %v1372_v30  ;;  %v1580_v11 = vpop.f32.mrb[5].mxu0 }
 0x41d   :  { %v1375_v32 = vpop.f32.mrb[6].mxu0 }
 0x41e   :  { %v1378_v33 = vmax.f32 %v1373_v31, 0.0  ;;  %v1581_v34 = vpop.f32.mrb[7].mxu0 }
 0x420   :  { %1380 = vst.msk [vmem:[#allocation7] sm:$0x3] %vm1379_vm3, %v1378_v33 }
 0x421   :  { %1873 = shalt.err (!%p1870_p6)
}
 0x422   :  { %s1874_s1 = scalar_lea.hbm %s2099_s9, 32 }
 0x423   :  { %p1875_p7 = scmp.ne.s32.totalorder %s2099_s9, %s1874_s1  ;;  %p1878_p8 = scmp.lt.u32.totalorder %s1874_s1, %s2099_s9 }
 0x425   :  { %p1880_p9 = pnand %p1878_p8, %p1875_p7 }
 0x427   :  { %1883 = shalt.err (!%p1880_p9)
}
 0x428   :  { %1390 = dma.vmem_to_hbm [thread:$0]  %s1388_s11, 32, %s2099_s9, [#allocation4]  }
 0x429   :  { %1888 = dma.done.wait [#allocation4], 32  }
 0x42a   :  { %1889 = vsyncadd [#allocation4], 4294967264 }
 0x42b   :  { %1394 = vsyncpa [#allocation3], 1 }
 0x42c   :  { %1395 = vsyncpa [#allocation6], 1 }
 0x42d   :  { %1396 = vsyncpa [#allocation4], 1 }

</bundles_post_ra>
